<compile_context>
chip_gen: v6e
topology: v6e:2x2x1
jax: 0.10.0
libtpu: 0.0.40
codegen_flags: <defaults>
</compile_context>

<pallas_src>
import functools
import math

import jax
import jax.numpy as jnp
from jax.experimental import pallas as pl
from jax.experimental.pallas import tpu as pltpu


# ---------------------------------------------------------------------------
# Linear (x @ W + b), tiled over rows.  Weight / bias index maps are constant,
# so their blocks are fetched once; only the activation rows are pipelined.
# ---------------------------------------------------------------------------
def _linear_kernel(x_ref, w_ref, b_ref, o_ref):
    x = x_ref[...].astype(w_ref.dtype)                    # bf16 (or f32) MXU operands
    acc = jnp.dot(x, w_ref[...], preferred_element_type=jnp.float32)
    acc = acc + b_ref[...]                                # f32 bias (1, N) broadcasts
    o_ref[...] = acc.astype(o_ref.dtype)


def _linear(x2d, w, b, out_dtype, block_rows):
    R, K = x2d.shape
    N = w.shape[1]
    br = min(block_rows, R)
    if R % br != 0:
        br = R                                            # small shapes: single block
    cost = pl.CostEstimate(
        flops=2 * R * K * N,
        transcendentals=0,
        bytes_accessed=(R * K * x2d.dtype.itemsize
                        + K * N * w.dtype.itemsize
                        + R * N * jnp.dtype(out_dtype).itemsize),
    )
    return pl.pallas_call(
        _linear_kernel,
        out_shape=jax.ShapeDtypeStruct((R, N), out_dtype),
        grid=(R // br,),
        in_specs=[
            pl.BlockSpec((br, K), lambda i: (i, 0)),      # activation row tiles
            pl.BlockSpec((K, N), lambda i: (0, 0)),       # weight: grid-invariant
            pl.BlockSpec((1, N), lambda i: (0, 0)),       # bias:   grid-invariant
        ],
        out_specs=pl.BlockSpec((br, N), lambda i: (i, 0)),
        compiler_params=pltpu.CompilerParams(dimension_semantics=("parallel",)),
        cost_estimate=cost,
    )(x2d, w, b)


# ---------------------------------------------------------------------------
# Flash-style causal attention: one (batch, head, q-block) per parallel grid
# point, kv blocks on the last ("arbitrary") axis with online softmax.
# ---------------------------------------------------------------------------
def _flash_attn_kernel(q_ref, k_ref, v_ref, o_ref, m_sc, l_sc, acc_sc,
                       *, sm_scale, block_q, block_k):
    qi = pl.program_id(2)
    ki = pl.program_id(3)

    @pl.when(ki == 0)
    def _():
        m_sc[...] = jnp.full_like(m_sc, -jnp.inf)
        l_sc[...] = jnp.zeros_like(l_sc)
        acc_sc[...] = jnp.zeros_like(acc_sc)

    # Causal block skip: a kv block contributes only if its first column is
    # <= the last query row of this q block (roughly halves attention FLOPs).
    @pl.when(ki * block_k <= qi * block_q + (block_q - 1))
    def _():
        q = q_ref[0, 0]                                   # (tq, hd) compute dtype
        k = k_ref[0, 0]                                   # (tk, hd)
        # scores: contract over head_dim, f32 MXU accumulation
        s = jax.lax.dot_general(q, k, (((1,), (1,)), ((), ())),
                                preferred_element_type=jnp.float32) * sm_scale
        # element-level causal mask (only bites on the diagonal block); finite
        # large-negative value instead of -inf so fully-masked rows never NaN.
        row = qi * block_q + jax.lax.broadcasted_iota(jnp.int32, s.shape, 0)
        col = ki * block_k + jax.lax.broadcasted_iota(jnp.int32, s.shape, 1)
        s = jnp.where(col <= row, s, -1e30)

        m_prev = m_sc[...]
        m_new = jnp.maximum(m_prev, jnp.max(s, axis=-1, keepdims=True))
        alpha = jnp.exp(m_prev - m_new)                   # f32 (EUP)
        p = jnp.exp(s - m_new)                            # f32 (EUP)
        l_sc[...] = alpha * l_sc[...] + jnp.sum(p, axis=-1, keepdims=True)
        acc_sc[...] = alpha * acc_sc[...] + jnp.dot(
            p.astype(v_ref.dtype), v_ref[0, 0], preferred_element_type=jnp.float32)
        m_sc[...] = m_new

    @pl.when(ki == pl.num_programs(3) - 1)
    def _():
        inv_l = pl.reciprocal(l_sc[...], approx=True)     # EUP reciprocal (off VALU)
        o_ref[0, 0] = (acc_sc[...] * inv_l).astype(o_ref.dtype)


def _flash_attention(q, k, v, *, block_q, block_k):
    B, H, T, hd = q.shape
    bq = min(block_q, T)
    if T % bq != 0:
        bq = T
    bk = min(block_k, T)
    if T % bk != 0:
        bk = T
    nq, nk = T // bq, T // bk
    sm_scale = 1.0 / math.sqrt(hd)

    kernel = functools.partial(_flash_attn_kernel, sm_scale=sm_scale,
                               block_q=bq, block_k=bk)
    cost = pl.CostEstimate(
        flops=4 * B * H * T * T * hd,                     # QK^T + PV (pre-skip bound)
        transcendentals=B * H * T * T,
        bytes_accessed=4 * B * H * T * hd * q.dtype.itemsize,
    )
    return pl.pallas_call(
        kernel,
        out_shape=jax.ShapeDtypeStruct((B, H, T, hd), q.dtype),
        grid=(B, H, nq, nk),
        in_specs=[
            pl.BlockSpec((1, 1, bq, hd), lambda b, h, qi, ki: (b, h, qi, 0)),
            pl.BlockSpec((1, 1, bk, hd), lambda b, h, qi, ki: (b, h, ki, 0)),
            pl.BlockSpec((1, 1, bk, hd), lambda b, h, qi, ki: (b, h, ki, 0)),
        ],
        out_specs=pl.BlockSpec((1, 1, bq, hd), lambda b, h, qi, ki: (b, h, qi, 0)),
        scratch_shapes=[
            pltpu.VMEM((bq, 1), jnp.float32),             # running max m
            pltpu.VMEM((bq, 1), jnp.float32),             # running sum l
            pltpu.VMEM((bq, hd), jnp.float32),            # f32 output accumulator
        ],
        compiler_params=pltpu.CompilerParams(
            dimension_semantics=("parallel", "parallel", "parallel", "arbitrary")),
        cost_estimate=cost,
    )(q, k, v)


# ---------------------------------------------------------------------------
# Full module forward.
# ---------------------------------------------------------------------------
def causal_self_attention(x, w_attn, b_attn, w_proj, b_proj, n_head,
                          *, block_q=128, block_k=128, block_rows=256,
                          compute_dtype=jnp.bfloat16):
    """Forward pass of CausalSelfAttention (inference: dropout = 0)."""
    B, T, C = x.shape
    assert C % n_head == 0
    hd = C // n_head

    w_attn_c = w_attn.astype(compute_dtype)
    w_proj_c = w_proj.astype(compute_dtype)
    b_attn_f = b_attn.astype(jnp.float32)
    b_proj_f = b_proj.astype(jnp.float32)

    # 1) fused QKV projection -> (B*T, 3C); activations kept in compute dtype.
    qkv = _linear(x.reshape(B * T, C), w_attn_c, b_attn_f, compute_dtype, block_rows)

    # 2) split heads (wrapper-side layout plumbing -> lane-dense per-head tiles).
    qkv = qkv.reshape(B, T, 3, n_head, hd).transpose(2, 0, 3, 1, 4)  # (3,B,H,T,hd)
    q, k, v = qkv[0], qkv[1], qkv[2]

    # 3) flash attention with online softmax + causal block skipping.
    o = _flash_attention(q, k, v, block_q=block_q, block_k=block_k)  # (B,H,T,hd)

    # 4) merge heads + output projection back to x.dtype.
    y = o.transpose(0, 2, 1, 3).reshape(B * T, C)
    out = _linear(y, w_proj_c, b_proj_f, x.dtype, block_rows)
    # TODO(synk): attn_dropout / resid_dropout are identity at inference (p=0.0);
    # training-mode dropout is not implemented.
    return out.reshape(B, T, C)


# ---------------------------------------------------------------------------
# Pure-JAX reference mirroring the PyTorch forward (dropout = 0).
# ---------------------------------------------------------------------------
def _reference(x, w_attn, b_attn, w_proj, b_proj, n_head):
    B, T, C = x.shape
    hd = C // n_head
    qkv = x @ w_attn + b_attn[0]
    q, k, v = jnp.split(qkv, 3, axis=-1)

    def to_heads(t):
        return t.reshape(B, T, n_head, hd).transpose(0, 2, 1, 3)     # (B,H,T,hd)

    q, k, v = to_heads(q), to_heads(k), to_heads(v)
    att = jnp.einsum('bhtd,bhsd->bhts', q, k) / math.sqrt(hd)
    mask = jnp.tril(jnp.ones((T, T), bool))
    att = jnp.where(mask, att, -jnp.inf)
    att = jax.nn.softmax(att, axis=-1)
    y = jnp.einsum('bhts,bhsd->bhtd', att, v)
    y = y.transpose(0, 2, 1, 3).reshape(B, T, C)
    return y @ w_proj + b_proj[0]


if __name__ == "__main__":
    # config: n_embd=32, n_head=4, bias=True, dropout=0.0, block_size >= T
    B, T, C, n_head = 2, 8, 32, 4

    key = jax.random.PRNGKey(0)
    kx, k1, k2, k3, k4 = jax.random.split(key, 5)

    x = jax.random.normal(kx, (B, T, C), dtype=jnp.float32)
    # deterministic synthetic parameters (stored as [in, out])
    w_attn = jax.random.normal(k1, (C, 3 * C), dtype=jnp.float32) * 0.02
    b_attn = jax.random.normal(k2, (1, 3 * C), dtype=jnp.float32) * 0.02
    w_proj = jax.random.normal(k3, (C, C), dtype=jnp.float32) * 0.02
    b_proj = jax.random.normal(k4, (1, C), dtype=jnp.float32) * 0.02

    y_ref = _reference(x, w_attn, b_attn, w_proj, b_proj, n_head)

    # bf16 MXU operands (default, performance path)
    y_bf16 = jax.block_until_ready(
        causal_self_attention(x, w_attn, b_attn, w_proj, b_proj, n_head))
    assert jnp.allclose(y_bf16, y_ref, atol=2e-2, rtol=2e-2), "bf16 kernel mismatch"

    # f32 path for a tight numerical check of the same kernels
    y_f32 = jax.block_until_ready(
        causal_self_attention(x, w_attn, b_attn, w_proj, b_proj, n_head,
                              compute_dtype=jnp.float32))
    assert jnp.allclose(y_f32, y_ref, atol=2e-3, rtol=2e-3), "f32 kernel mismatch"

    print("KERNEL_OK")
</pallas_src>

<mosaic_0001>
module attributes {stable_mosaic.version = 11 : i64} {
  func.func @_linear_kernel(%arg0: i32, %arg1: memref<16x32xf32, #tpu.memory_space<vmem>>, %arg2: memref<32x96xbf16, #tpu.memory_space<vmem>>, %arg3: memref<1x96xf32, #tpu.memory_space<vmem>>, %arg4: memref<16x96xbf16, #tpu.memory_space<vmem>>) attributes {dimension_semantics = [#tpu.dimension_semantics<parallel>], iteration_bounds = array<i64: 1>, scalar_prefetch = 0 : i64, scratch_operands = 0 : i64, tpu.core_type = #tpu.core_type<tc>, window_params = [{transform_indices = @transform_0, window_bounds = array<i64: 16, 32>}, {pipeline_mode = #tpu.pipeline_mode<synchronous>, transform_indices = @transform_1, window_bounds = array<i64: 32, 96>}, {pipeline_mode = #tpu.pipeline_mode<synchronous>, transform_indices = @transform_2, window_bounds = array<i64: 1, 96>}, {transform_indices = @transform_3, window_bounds = array<i64: 16, 96>}]} {
    %c0 = arith.constant 0 : index
    %c0_0 = arith.constant 0 : index
    %0 = vector.load %arg1[%c0, %c0_0] : memref<16x32xf32, #tpu.memory_space<vmem>>, vector<16x32xf32>
    %1 = arith.truncf %0 : vector<16x32xf32> to vector<16x32xbf16>
    %c0_1 = arith.constant 0 : index
    %c0_2 = arith.constant 0 : index
    %2 = vector.load %arg2[%c0_1, %c0_2] : memref<32x96xbf16, #tpu.memory_space<vmem>>, vector<32x96xbf16>
    %cst = arith.constant dense<0.000000e+00> : vector<16x96xf32>
    %3 = tpu.matmul %1, %2, %cst {dimension_numbers = #tpu.dot_dimension_numbers<[1], [0], [0], [1], [0, 0, 1, 1], [], []>} : vector<16x32xbf16>, vector<32x96xbf16>, vector<16x96xf32> -> vector<16x96xf32>
    %c0_3 = arith.constant 0 : index
    %c0_4 = arith.constant 0 : index
    %4 = vector.load %arg3[%c0_3, %c0_4] : memref<1x96xf32, #tpu.memory_space<vmem>>, vector<1x96xf32>
    %5 = vector.broadcast %4 : vector<1x96xf32> to vector<16x96xf32>
    %6 = arith.addf %3, %5 : vector<16x96xf32>
    %7 = arith.truncf %6 : vector<16x96xf32> to vector<16x96xbf16>
    %c0_5 = arith.constant 0 : index
    %c0_6 = arith.constant 0 : index
    %8 = vector.load %arg4[%c0_5, %c0_6] : memref<16x96xbf16, #tpu.memory_space<vmem>>, vector<16x96xbf16>
    tpu.vector_store %arg4[%c0_5, %c0_6], %7 {strides = array<i32>} : memref<16x96xbf16, #tpu.memory_space<vmem>>, vector<16x96xbf16>,
    return
  }
  func.func @transform_0(%arg0: i32) -> (i32, i32) {
    %c0_i32 = arith.constant 0 : i32
    %c0_i32_0 = arith.constant 0 : i32
    return %arg0, %c0_i32 : i32, i32
  }
  func.func @transform_1(%arg0: i32) -> (i32, i32) {
    %c0_i32 = arith.constant 0 : i32
    %c0_i32_0 = arith.constant 0 : i32
    %c0_i32_1 = arith.constant 0 : i32
    return %c0_i32, %c0_i32_0 : i32, i32
  }
  func.func @transform_2(%arg0: i32) -> (i32, i32) {
    %c0_i32 = arith.constant 0 : i32
    %c0_i32_0 = arith.constant 0 : i32
    %c0_i32_1 = arith.constant 0 : i32
    return %c0_i32, %c0_i32_0 : i32, i32
  }
  func.func @transform_3(%arg0: i32) -> (i32, i32) {
    %c0_i32 = arith.constant 0 : i32
    %c0_i32_0 = arith.constant 0 : i32
    return %arg0, %c0_i32 : i32, i32
  }
}

</mosaic_0001>

<bundles_post_ra>
// kernel: tpu_custom_call.1
= control target key start
LH: loop header
LB: loop body
LE: loop exit
PB: predicated region body
PF: predicated region fallthrough
CT: control target
= control target key end

     0   :  { %8 = vsyncpa [#allocation3], 0  ;;  %s287_s0 = inlined_call_operand.hbm [shape: f32[16,32], index: 0, kind: input, shape index: {}]   ;;  %s288_s1 = inlined_call_operand.hbm [shape: bf16[32,96], index: 1, kind: input, shape index: {}]   ;;  %s289_s2 = inlined_call_operand.vmem [shape: f32[1,96], index: 2, kind: input, shape index: {}]   ;;  %s290_s3 = inlined_call_operand.hbm [shape: bf16[16,96], index: 3, kind: output, shape index: {}]  }
   0x1   :  { %9 = vsyncpa [#allocation6], 0 }
   0x2   :  { %10 = vsyncpa [#allocation4], 0  ;;  %s240_s12 = smov [#allocation2]  }
   0x3   :  { %s16_s13 = sshll.u32 %s240_s12, 4  ;;  %s17_s13 = int_to_ptr.vmem [resolvable:$true] %s16_s13 }
   0x4   :  { %s182_s14 = scalar_lea.vmem %s17_s13, 256  ;;  %p187_p1 = scmp.lt.s32.totalorder %s17_s13, %s17_s13 }
   0x5   :  { %p183_p0 = scmp.ne.s32.totalorder %s17_s13, %s182_s14  ;;  %p188_p2 = scmp.lt.s32.totalorder %s182_s14, %s182_s14 }
   0x7   :  { %p189_p3 = por %p188_p2, %p187_p1 }
   0x9   :  { %p190_p4 = pnand %p189_p3, %p183_p0 }
   0xb   :  { %193 = shalt.err (!%p190_p4)
}
   0xc   :  { %s241_s15 = smov 128   ;;  %s242_s16 = smov 8  }
   0xd   :  { %22 = dma.hbm_to_vmem [thread:$0]  %s287_s0, 256, %s17_s13, [#allocation3], %s241_s15, %s241_s15, %s242_s16  }
   0xe   :  { %s243_s19 = smov [#allocation5]  }
   0xf   :  { %s28_s20 = sshll.u32 %s243_s19, 4  ;;  %s29_s20 = int_to_ptr.vmem [resolvable:$true] %s28_s20 }
  0x10   :  { %s202_s21 = scalar_lea.vmem %s29_s20, 256  ;;  %p207_p6 = scmp.lt.s32.totalorder %s29_s20, %s29_s20 }
  0x11   :  { %p203_p5 = scmp.ne.s32.totalorder %s29_s20, %s202_s21  ;;  %p208_p7 = scmp.lt.s32.totalorder %s202_s21, %s202_s21 }
  0x13   :  { %p209_p8 = por %p208_p7, %p207_p6 }
  0x15   :  { %p210_p9 = pnand %p209_p8, %p203_p5 }
  0x17   :  { %213 = shalt.err (!%p210_p9)
}
  0x18   :  { %s244_s22 = smov 64   ;;  %s245_s23 = smov 4  }
  0x19   :  { %34 = dma.hbm_to_vmem [thread:$0]  %s288_s1, 256, %s29_s20, [#allocation6], %s244_s22, %s244_s22, %s245_s23  }
  0x1a   :  { %234 = dma.done.wait [#allocation3], 256  }
  0x1b   :  { %235 = vsyncadd [#allocation3], 4294967040 }
  0x1c   :  { %236 = dma.done.wait [#allocation6], 256  }
  0x1d   :  { %237 = vsyncadd [#allocation6], 4294967040  ;;  %v246_v0 = vmov 0.0   ;;  %vm247_vm0 = vmmov 0   ;;  %v172_v1 = vld [vmem:[#allocation5 + $0x8] sm:$0xff]   ;;  %v173_v2 = vld [vmem:[#allocation5] sm:$0xff]  }
  0x1e   :  { %155 = vmatprep.subr.bf16.mxu0 %v246_v0  ;;  %159 = vmatprep.mubr.msk.bf16.mxu0 %vm247_vm0, %v246_v0  ;;  %v44_v3 = vld [vmem:[#allocation2] sm:$0xff]  ;;  %v45_v4 = vld [vmem:[#allocation2 + $0x8] sm:$0xff]  ;;  %vm70_vm1 = vcmask 261120   ;;  %vm123_vm2 = vcmask 781312   ;;  %s248_s26 = smov [#allocation7]  }
  0x1f   :  { %156 = vmatpush3.bf16.msra.mxu0 %v172_v1  ;;  %v46_v5 = vpack.c.bf16 %v45_v4, %v44_v3  ;;  %v144_v6 = vld [vmem:[%s289_s2] ss:$0 sm:$0xff]  ;;  %s131_s27 = sshll.u32 %s248_s26, 4  ;;  %s132_s27 = int_to_ptr.vmem [resolvable:$true] %s131_s27 }
  0x20   :  { %157 = vmatprep.subr.bf16.mxu0 %v246_v0  ;;  %s214_s28 = scalar_lea.vmem %s132_s27, 128  ;;  %p219_p11 = scmp.lt.s32.totalorder %s132_s27, %s132_s27 }
  0x21   :  { %p215_p10 = scmp.ne.s32.totalorder %s132_s27, %s214_s28  ;;  %p220_p12 = scmp.lt.s32.totalorder %s214_s28, %s214_s28 }
  0x23   :  { %158 = vmatpush3.bf16.msra.mxu0 %v173_v2  ;;  %p221_p13 = por %p220_p12, %p219_p11 }
  0x25   :  { %p222_p0 = pnand %p221_p13, %p215_p10 }
  0x26   :  { %160 = vmatmul.mubr.msk.bf16.vlgmr.msra.gmra.mxu0 %vm70_vm1, %v46_v5 }
  0xe6   :  { %v108_v7 = vpop.f32.mrf.mxu0 }
  0xe7   :  { %v109_v8 = vadd.f32 %v144_v6, %v108_v7 }
  0xe8   :  { %v161_v9 = vpop.f32.mrf.mxu0 }
  0xe9   :  { %v150_v10 = vpack.c.bf16 %v109_v8, %v109_v8 }
  0xea   :  { %v111_v11 = vpop.f32.mrf.mxu0 }
  0xeb   :  { %v112_v12 = vadd.f32 %v144_v6, %v111_v11  ;;  %124 = vst.msk [vmem:[#allocation7] sm:$0xf] %vm123_vm2, %v150_v10 }
  0xec   :  { %v162_v13 = vpop.f32.mrf.mxu0 }
  0xed   :  { %v151_v14 = vpack.c.bf16 %v112_v12, %v112_v12 }
  0xef   :  { %125 = vst.msk [vmem:[#allocation7 + $0x4] sm:$0xf] %vm123_vm2, %v151_v14 }
  0xf0   :  { %225 = shalt.err (!%p222_p0)
}
  0xf1   :  { %137 = dma.vmem_to_hbm [thread:$0]  %s132_s27, 128, %s290_s3, [#allocation4], %s244_s22, %s244_s22, %s245_s23  }
  0xf2   :  { %238 = dma.done.wait [#allocation4], 128  }
  0xf3   :  { %239 = vsyncadd [#allocation4], 4294967168 }
  0xf4   :  { %141 = vsyncpa [#allocation3], 1 }
  0xf5   :  { %142 = vsyncpa [#allocation6], 1 }
  0xf6   :  { %143 = vsyncpa [#allocation4], 1 }

</bundles_post_ra>
